<compile_context>
chip_gen: v7x
topology: tpu7x:2x2x1
jax: 0.10.0
libtpu: 0.0.40
codegen_flags: <defaults>
</compile_context>

<pallas_src>
import jax
import jax.numpy as jnp
from jax import lax
from jax.experimental import pallas as pl
from jax.experimental.pallas import tpu as pltpu

# ----------------------------- problem sizes -----------------------------
B = 2                  # batch
C_IN = 4               # DNA one-hot channels (A,C,G,T)
L = 16                 # sequence length
K = 5                  # conv kernel width
H = 32                 # hidden / embedding width
L_OUT = L - K + 1      # valid conv output length (12)
KC = K * C_IN          # flattened conv taps per window (20)
KC1 = KC + 1           # + ones column carrying the conv bias (21)
KC_PAD = 24            # pad to a sublane multiple -> clean in-kernel row views
R = 2 * B * L_OUT      # stacked im2col rows: [pre_0, pre_1, post_0, post_1] (48)
WCAT_ROWS = KC_PAD + R # packed parameter slab rows (72)


# ------------------------------ Pallas kernel -----------------------------
def prepost_kernel(win_ref, wcat_ref, slen_ref, sc_ref, out_ref):
    """Full-array VMEM blocks (SMEM for the two true scalars).

    win_ref  : (R, KC_PAD)      im2col windows for stacked pre+post;
                                col KC is 1.0 (bias), cols > KC1 are zero pad
    wcat_ref : (WCAT_ROWS, H)   rows [0, KC_PAD): conv taps + bias row + pad;
                                rows [KC_PAD, WCAT_ROWS): per-row predictor
                                weights (w_pre / w_post) pre-scaled by 1/L_OUT
    slen_ref : (B, 1)           STR length feature
    sc_ref   : SMEM (2,)        [w_str, b_lin]
    out_ref  : (B, 1)           logit
    """
    wconv = wcat_ref[0:KC_PAD, :]          # (KC_PAD, H) sublane-aligned view
    wrow = wcat_ref[KC_PAD:WCAT_ROWS, :]   # (R, H)

    # conv (+bias) for both sequences of the whole batch: one MXU push
    h = jnp.dot(win_ref[...], wconv, preferred_element_type=jnp.float32)  # (R, H)
    h = jnp.maximum(h, 0.0)                                               # ReLU (VPU)

    # fold predictor weights and the 1/L_OUT mean scale in one VPU multiply
    t = h * wrow                                                          # (R, H)

    # pre/post combine + mean pool as a 0/1 selection matmul.  The selection
    # matrix is a compile-time pattern, so it is generated in-kernel from two
    # iotas + compares (VPU) instead of costing a DMA descriptor.
    b_idx = lax.broadcasted_iota(jnp.int32, (B, R), 0)
    r_idx = lax.broadcasted_iota(jnp.int32, (B, R), 1)
    pre_lo = b_idx * L_OUT           # pre rows of batch b:  [b*L_OUT, (b+1)*L_OUT)
    post_lo = (b_idx + B) * L_OUT    # post rows of batch b: [(B+b)*L_OUT, ...)
    sel = (((r_idx >= pre_lo) & (r_idx < pre_lo + L_OUT)) |
           ((r_idx >= post_lo) & (r_idx < post_lo + L_OUT)))
    pool = sel.astype(jnp.float32)                                        # (B, R)

    m = jnp.dot(pool, t, preferred_element_type=jnp.float32)              # (B, H)
    red = jnp.sum(m, axis=1, keepdims=True)                               # (B, 1) XLU

    out_ref[...] = red + slen_ref[...] * sc_ref[0] + sc_ref[1]


# ------------------------------ wrapper ------------------------------------
@jax.jit
def prepost_model_strlen(pre_seq_ncl, post_seq_ncl, str_len, params):
    """pre_seq_ncl, post_seq_ncl: (B, C_IN, L) NCL (PyTorch layout).
       str_len: (B,) float32.  Returns (B, 1) logits."""
    # stack pre/post along batch, NCL -> NLC (channels-last)
    x = jnp.concatenate([pre_seq_ncl, post_seq_ncl], axis=0)            # (2B, C, L)
    x = jnp.transpose(x, (0, 2, 1)).astype(jnp.float32)                 # (2B, L, C)

    # im2col: wins[s, t, k, c] = x[s, t+k, c]  -> flat contraction idx k*C + c
    wins = jnp.stack([x[:, k:k + L_OUT, :] for k in range(K)], axis=2)  # (2B, L_OUT, K, C)
    wins = wins.reshape(R, KC)
    wins = jnp.concatenate(
        [wins,
         jnp.ones((R, 1), jnp.float32),                                 # bias column
         jnp.zeros((R, KC_PAD - KC1), jnp.float32)], axis=1)            # (R, KC_PAD)

    # packed parameter slab: conv taps (K*C, H) + bias row + zero pad to 24
    # rows, followed by per-row predictor weights (pre rows then post rows),
    # pre-scaled by 1/L_OUT so the in-kernel pool matrix is pure 0/1.
    wconv = jnp.concatenate(
        [params['w_conv'].reshape(KC, H),
         params['b_conv'].reshape(1, H),
         jnp.zeros((KC_PAD - KC1, H), jnp.float32)], axis=0)            # (KC_PAD, H)
    wrow = jnp.concatenate(
        [jnp.tile(params['w_pre'].reshape(1, H), (B * L_OUT, 1)),
         jnp.tile(params['w_post'].reshape(1, H), (B * L_OUT, 1))],
        axis=0) * (1.0 / float(L_OUT))                                  # (R, H)
    wcat = jnp.concatenate([wconv, wrow], axis=0)                       # (WCAT_ROWS, H)

    slen = str_len.reshape(B, 1).astype(jnp.float32)
    scalars = jnp.concatenate(
        [params['w_str'].reshape(1),
         params['b_lin'].reshape(1)]).astype(jnp.float32)               # (2,)

    vmem = pl.BlockSpec(memory_space=pltpu.MemorySpace.VMEM)
    smem = pl.BlockSpec(memory_space=pltpu.MemorySpace.SMEM)
    return pl.pallas_call(
        prepost_kernel,
        out_shape=jax.ShapeDtypeStruct((B, 1), jnp.float32),
        in_specs=[vmem, vmem, vmem, smem],
        out_specs=vmem,
    )(wins, wcat, slen, scalars)


# --------------------------- pure-JAX reference -----------------------------
def reference_forward(pre_seq_ncl, post_seq_ncl, str_len, params):
    pre = jnp.transpose(pre_seq_ncl, (0, 2, 1)).astype(jnp.float32)
    post = jnp.transpose(post_seq_ncl, (0, 2, 1)).astype(jnp.float32)

    def fe(x):
        acc = jnp.zeros((B, L_OUT, H), jnp.float32)
        for k in range(K):
            acc = acc + jnp.einsum('blc,ch->blh', x[:, k:k + L_OUT, :],
                                   params['w_conv'][k])
        acc = jnp.maximum(acc + params['b_conv'][None, :, :], 0.0)
        return acc.mean(axis=1)

    f_pre, f_post = fe(pre), fe(post)
    return (f_pre @ params['w_pre'] + f_post @ params['w_post']
            + str_len.reshape(B, 1) * params['w_str'] + params['b_lin'])


# ---------------------------------- main ------------------------------------
if __name__ == "__main__":
    key = jax.random.PRNGKey(0)
    k_pre, k_post, k_len, k_wc, k_bc, k_wp, k_wq, k_ws, k_bl = jax.random.split(key, 9)

    # one-hot DNA inputs in PyTorch NCL layout (B, 4, L)
    pre_idx = jax.random.randint(k_pre, (B, L), 0, C_IN)
    post_idx = jax.random.randint(k_post, (B, L), 0, C_IN)
    pre_seq = jnp.transpose(jax.nn.one_hot(pre_idx, C_IN, dtype=jnp.float32), (0, 2, 1))
    post_seq = jnp.transpose(jax.nn.one_hot(post_idx, C_IN, dtype=jnp.float32), (0, 2, 1))
    str_len = jax.random.uniform(k_len, (B,), jnp.float32, 2.0, 20.0)

    # deterministic synthetic parameters (shapes implied by the module design)
    params = {
        'w_conv': 0.1 * jax.random.normal(k_wc, (K, C_IN, H), jnp.float32),
        'b_conv': 0.1 * jax.random.normal(k_bc, (1, H), jnp.float32),
        'w_pre': 0.1 * jax.random.normal(k_wp, (H, 1), jnp.float32),
        'w_post': 0.1 * jax.random.normal(k_wq, (H, 1), jnp.float32),
        'w_str': 0.1 * jax.random.normal(k_ws, (1, 1), jnp.float32),
        'b_lin': 0.1 * jax.random.normal(k_bl, (1, 1), jnp.float32),
    }

    out = prepost_model_strlen(pre_seq, post_seq, str_len, params)
    out = jax.block_until_ready(out)

    ref = reference_forward(pre_seq, post_seq, str_len, params)
    assert out.shape == (B, 1)
    assert jnp.allclose(out, ref, atol=1e-4, rtol=1e-4), (out, ref)

    print("KERNEL_OK")
</pallas_src>

<mosaic_0001>
module attributes {stable_mosaic.version = 11 : i64} {
  func.func @prepost_kernel(%arg0: memref<48x24xf32, #tpu.memory_space<vmem>>, %arg1: memref<72x32xf32, #tpu.memory_space<vmem>>, %arg2: memref<2x1xf32, #tpu.memory_space<vmem>>, %arg3: memref<2xf32, #tpu.memory_space<smem>>, %arg4: memref<2x1xf32, #tpu.memory_space<vmem>>) attributes {dimension_semantics = [], scalar_prefetch = 0 : i64, scratch_operands = 0 : i64, tpu.core_type = #tpu.core_type<tc>} {
    %c0 = arith.constant 0 : index
    %c0_0 = arith.constant 0 : index
    %0 = vector.load %arg1[%c0, %c0_0] : memref<72x32xf32, #tpu.memory_space<vmem>>, vector<24x32xf32>
    %c24 = arith.constant 24 : index
    %c0_1 = arith.constant 0 : index
    %1 = vector.load %arg1[%c24, %c0_1] : memref<72x32xf32, #tpu.memory_space<vmem>>, vector<48x32xf32>
    %c0_2 = arith.constant 0 : index
    %c0_3 = arith.constant 0 : index
    %2 = vector.load %arg0[%c0_2, %c0_3] : memref<48x24xf32, #tpu.memory_space<vmem>>, vector<48x24xf32>
    %cst = arith.constant dense<0.000000e+00> : vector<48x32xf32>
    %3 = tpu.matmul %2, %0, %cst {dimension_numbers = #tpu.dot_dimension_numbers<[1], [0], [0], [1], [0, 0, 1, 1], [], []>} : vector<48x24xf32>, vector<24x32xf32>, vector<48x32xf32> -> vector<48x32xf32>
    %cst_4 = arith.constant 0.000000e+00 : f32
    %4 = vector.broadcast %cst_4 : f32 to vector<48x32xf32>
    %5 = arith.maximumf %3, %4 : vector<48x32xf32>
    %6 = arith.mulf %5, %1 : vector<48x32xf32>
    %7 = tpu.iota {dimensions = array<i32: 0>} : vector<2x48xi32>
    %8 = tpu.iota {dimensions = array<i32: 1>} : vector<2x48xi32>
    %c12_i32 = arith.constant 12 : i32
    %9 = vector.broadcast %c12_i32 : i32 to vector<2x48xi32>
    %10 = arith.muli %7, %9 : vector<2x48xi32>
    %c2_i32 = arith.constant 2 : i32
    %11 = vector.broadcast %c2_i32 : i32 to vector<2x48xi32>
    %12 = arith.addi %7, %11 : vector<2x48xi32>
    %c12_i32_5 = arith.constant 12 : i32
    %13 = vector.broadcast %c12_i32_5 : i32 to vector<2x48xi32>
    %14 = arith.muli %12, %13 : vector<2x48xi32>
    %15 = arith.cmpi sge, %8, %10 : vector<2x48xi32>
    %c12_i32_6 = arith.constant 12 : i32
    %16 = vector.broadcast %c12_i32_6 : i32 to vector<2x48xi32>
    %17 = arith.addi %10, %16 : vector<2x48xi32>
    %18 = arith.cmpi slt, %8, %17 : vector<2x48xi32>
    %19 = arith.andi %15, %18 : vector<2x48xi1>
    %20 = arith.cmpi sge, %8, %14 : vector<2x48xi32>
    %c12_i32_7 = arith.constant 12 : i32
    %21 = vector.broadcast %c12_i32_7 : i32 to vector<2x48xi32>
    %22 = arith.addi %14, %21 : vector<2x48xi32>
    %23 = arith.cmpi slt, %8, %22 : vector<2x48xi32>
    %24 = arith.andi %20, %23 : vector<2x48xi1>
    %25 = arith.ori %19, %24 : vector<2x48xi1>
    %26 = arith.extui %25 : vector<2x48xi1> to vector<2x48xi32>
    %27 = arith.sitofp %26 : vector<2x48xi32> to vector<2x48xf32>
    %cst_8 = arith.constant dense<0.000000e+00> : vector<2x32xf32>
    %28 = tpu.matmul %27, %6, %cst_8 {dimension_numbers = #tpu.dot_dimension_numbers<[1], [0], [0], [1], [0, 0, 1, 1], [], []>} : vector<2x48xf32>, vector<48x32xf32>, vector<2x32xf32> -> vector<2x32xf32>
    %cst_9 = arith.constant dense<0.000000e+00> : vector<2xf32>
    %29 = vector.multi_reduction <add>, %28, %cst_9 [1] : vector<2x32xf32> to vector<2xf32>
    %30 = vector.shape_cast %29 : vector<2xf32> to vector<2x1xf32>
    %c0_10 = arith.constant 0 : index
    %c0_11 = arith.constant 0 : index
    %31 = vector.load %arg2[%c0_10, %c0_11] : memref<2x1xf32, #tpu.memory_space<vmem>>, vector<2x1xf32>
    %c0_12 = arith.constant 0 : index
    %32 = memref.load %arg3[%c0_12] : memref<2xf32, #tpu.memory_space<smem>>
    %33 = vector.broadcast %32 : f32 to vector<2x1xf32>
    %34 = arith.mulf %31, %33 : vector<2x1xf32>
    %35 = arith.addf %30, %34 : vector<2x1xf32>
    %c1 = arith.constant 1 : index
    %36 = memref.load %arg3[%c1] : memref<2xf32, #tpu.memory_space<smem>>
    %37 = vector.broadcast %36 : f32 to vector<2x1xf32>
    %38 = arith.addf %35, %37 : vector<2x1xf32>
    %c0_13 = arith.constant 0 : index
    %c0_14 = arith.constant 0 : index
    %39 = vector.load %arg4[%c0_13, %c0_14] : memref<2x1xf32, #tpu.memory_space<vmem>>, vector<2x1xf32>
    tpu.vector_store %arg4[%c0_13, %c0_14], %38 {strides = array<i32>} : memref<2x1xf32, #tpu.memory_space<vmem>>, vector<2x1xf32>,
    return
  }
}

</mosaic_0001>

<bundles_post_ra>
// kernel: prepost_model_strlen.1
= control target key start
LH: loop header
LB: loop body
LE: loop exit
PB: predicated region body
PF: predicated region fallthrough
CT: control target
= control target key end

     0   :  { %9 = vsyncpa [#allocation3], 0  ;;  %s457_s0 = inlined_call_operand.vmem [shape: f32[48,24], index: 0, kind: input, shape index: {}]   ;;  %s458_s1 = inlined_call_operand.vmem [shape: f32[72,32], index: 1, kind: input, shape index: {}]   ;;  %s459_s2 = inlined_call_operand.vmem [shape: f32[2,1], index: 2, kind: input, shape index: {}]   ;;  %s460_s3 = inlined_call_operand.vmem [shape: f32[2], index: 3, kind: input, shape index: {}]   ;;  %s461_s4 = inlined_call_operand.vmem [shape: f32[2,1], index: 4, kind: output, shape index: {}]  }
   0x1   :  { %s22_s17 = sshll.u32 %s460_s3, 4  ;;  %s23_s17 = int_to_ptr.vmem [resolvable:$true] %s22_s17 }
   0x2   :  { %s354_s18 = scalar_lea.vmem %s23_s17, 16  ;;  %p359_p1 = scmp.lt.s32.totalorder %s23_s17, %s23_s17 }
   0x3   :  { %p355_p0 = scmp.ne.s32.totalorder %s23_s17, %s354_s18  ;;  %p360_p2 = scmp.lt.s32.totalorder %s354_s18, %s354_s18 }
   0x5   :  { %p361_p3 = por %p360_p2, %p359_p1 }
   0x7   :  { %p362_p4 = pnand %p361_p3, %p355_p0 }
   0x9   :  { %365 = shalt.err (!%p362_p4)
}
   0xa   :  { %s368_s19 = smov [#allocation2]  }
   0xb   :  { %25 = dma.vmem_to_smem %s23_s17, 16, %s368_s19, [#allocation3]  }
   0xc   :  { %366 = dma.done.wait [#allocation3], 16  }
   0xd   :  { %367 = vsyncadd [#allocation3], 4294967280 }
   0xe   :  { %29 = sfence }
   0xf   :  { %v30_v0 = vld [vmem:[%s458_s1] sm:$0xff]  ;;  %v31_v1 = vld [vmem:[%s458_s1 + $0x8] sm:$0xff]  ;;  %vm45_vm0 = vcmask 195584   ;;  %v32_v4 = vld [vmem:[%s458_s1 + $0x10] sm:$0xff]  ;;  %v369_v10 = vmov 0.0|0.0   ;;  %vm370_vm1 = vmmov 0   ;;  %v171_v12 = vlaneseq }
  0x10   :  { %v337_v2 = vpack.c.bf16 %v31_v1, %v30_v0  ;;  %v39_v3 = vld [vmem:[%s457_s0] sm:$0xff]  ;;  %v40_v5 = vld [vmem:[%s457_s0 + $0x8] sm:$0xff]  ;;  %v41_v6 = vld [vmem:[%s457_s0 + $0x10] sm:$0xff]  ;;  %341 = vmatprep.subr.bf16.mxu1 %v369_v10  ;;  %v371_v11 = vmov 0.0   ;;  %vm189_vm9 = vcmask 392192   ;;  %vm263_vm10 = vcmask 254976  }
  0x11   :  { %313 = vmatprep.mubr.msk.f32.mxu0 %vm45_vm0, %v39_v3  ;;  %v42_v7 = vld [vmem:[%s457_s0 + $0x18] sm:$0xff]  ;;  %v43_v8 = vld [vmem:[%s457_s0 + $0x20] sm:$0xff]  ;;  %v44_v9 = vld [vmem:[%s457_s0 + $0x28] sm:$0xff]  ;;  %334 = vmatprep.mubr.msk.f32.mxu1 %vm370_vm1, %v371_v11  ;;  %v172_v13 = vshrl.u32 %v171_v12, 7  ;;  %v174_v23 = vand.u32 127, %v171_v12  ;;  %s290_s22 = sld [smem:[#allocation2 + $0x1]] }
  0x12   :  { %338 = vmatprep.subr.bf16.mxu0 %v337_v2  ;;  %v34_v17 = vld [vmem:[%s458_s1 + $0x20] sm:$0xff]  ;;  %v33_v20 = vld [vmem:[%s458_s1 + $0x18] sm:$0xff]  ;;  %v36_v28 = vld [vmem:[%s458_s1 + $0x30] sm:$0xff]  ;;  %vm275_vm11 = vcmask 1024  }
  0x13   :  { %340 = vmatpush3.bf16.msra.mxu0 %v337_v2  ;;  %v176_v14 = vadd.s32 2, %v172_v13  ;;  %v175_v15 = vmul.u32 12, %v172_v13  ;;  %v35_v31 = vld [vmem:[%s458_s1 + $0x28] sm:$0xff]  ;;  %v38_v37 = vld [vmem:[%s458_s1 + $0x40] sm:$0xff]  ;;  %v37_v40 = vld [vmem:[%s458_s1 + $0x38] sm:$0xff]  ;;  %s268_s1 = sld [smem:[#allocation2]] }
  0x14   :  { %311 = vmatprep.subr.mxu0 %v32_v4  ;;  %v267_v51 = vld [vmem:[%s459_s2] sm:$0x3] }
  0x15   :  { %v177_v16 = vmul.u32 12, %v176_v14  ;;  %v179_v24 = vadd.s32 12, %v175_v15  ;;  %vm178_vm2 = vcmp.ge.s32.totalorder %v174_v23, %v175_v15 }
  0x17   :  { %312 = vmatpush3.msra.mxu0 %v32_v4  ;;  %v183_v26 = vadd.s32 12, %v177_v16  ;;  %vm180_vm3 = vcmp.lt.s32.totalorder %v174_v23, %v179_v24  ;;  %vm182_vm4 = vcmp.ge.s32.totalorder %v174_v23, %v177_v16  ;;  %v273_v55 = vstv %s290_s22 }
  0x18   :  { %314 = vmatmul.mubr.msk.f32.vlgmr.msra.gmra.mrb[0].mxu0 %vm45_vm0, %v40_v5  ;;  %vm181_vm6 = vmand %vm178_vm2, %vm180_vm3 }
  0x19   :  { %316 = vmatprep.mubr.msk.f32.mxu0 %vm45_vm0, %v41_v6  ;;  %vm184_vm5 = vcmp.lt.s32.totalorder %v174_v23, %v183_v26  ;;  %v269_v52 = vstv %s268_s1 }
  0x1a   :  { %vm185_vm7 = vmand %vm182_vm4, %vm184_vm5  ;;  %v270_v53 = vmul.f32 %v269_v52, %v267_v51 }
  0x1b   :  { %vm186_vm8 = vmor %vm181_vm6, %vm185_vm7 }
  0x1c   :  { %317 = vmatmul.mubr.msk.f32.gmra.mrb[2].mxu0 %vm45_vm0, %v42_v7  ;;  %v288_v47 = vsel %vm186_vm8, 1.0, %v371_v11 }
  0x1d   :  { %319 = vmatprep.mubr.msk.f32.mxu0 %vm45_vm0, %v43_v8 }
  0x20   :  { %320 = vmatmul.mubr.msk.f32.gmra.mrb[4].mxu0 %vm45_vm0, %v44_v9 }
  0xeb   :  { %v315_v18 = vpop.f32.mrb[0].mxu0 }
  0xec   :  { %v160_v19 = vmax.f32 %v315_v18, 0.0  ;;  %v130_v21 = vpop.f32.mrb[1].mxu0 }
  0xed   :  { %v159_v22 = vmax.f32 %v130_v21, 0.0 }
  0xee   :  { %v166_v25 = vmul.f32 %v160_v19, %v34_v17 }
  0xef   :  { %v165_v27 = vmul.f32 %v159_v22, %v33_v20  ;;  %v318_v29 = vpop.f32.mrb[2].mxu0 }
  0xf0   :  { %v162_v30 = vmax.f32 %v318_v29, 0.0  ;;  %v140_v32 = vpop.f32.mrb[3].mxu0 }
  0xf1   :  { %v161_v33 = vmax.f32 %v140_v32, 0.0  ;;  %v342_v34 = vpack.c.bf16 %v166_v25, %v165_v27 }
  0xf2   :  { %v168_v35 = vmul.f32 %v162_v30, %v36_v28 }
  0xf3   :  { %v167_v36 = vmul.f32 %v161_v33, %v35_v31  ;;  %v321_v38 = vpop.f32.mrb[4].mxu0  ;;  %343 = vmatpush3.bf16.msra.mxu1 %v342_v34 }
  0xf4   :  { %v164_v39 = vmax.f32 %v321_v38, 0.0  ;;  %v150_v41 = vpop.f32.mrb[5].mxu0  ;;  %344 = vmatprep.subr.bf16.mxu1 %v369_v10 }
  0xf5   :  { %v163_v42 = vmax.f32 %v150_v41, 0.0  ;;  %v345_v43 = vpack.c.bf16 %v168_v35, %v167_v36 }
  0xf6   :  { %v170_v44 = vmul.f32 %v164_v39, %v38_v37 }
  0xf7   :  { %v169_v45 = vmul.f32 %v163_v42, %v37_v40  ;;  %346 = vmatpush3.bf16.msra.mxu1 %v345_v43 }
  0xf8   :  { %347 = vmatprep.subr.bf16.mxu1 %v369_v10 }
  0xf9   :  { %v348_v46 = vpack.c.bf16 %v170_v44, %v169_v45 }
  0xfb   :  { %349 = vmatpush3.bf16.msra.mxu1 %v348_v46 }
  0xfe   :  { %335 = vmatmul.mubr.msk.f32.vlgmr.msra.gmra.mrb[0].mxu1 %vm189_vm9, %v288_v47 }
 0x1d1   :  { %v259_v48 = vpop.f32.mrb[0].mxu1 }
 0x1d2   :  { %v336_v49 = vpop.f32.mrb[1].mxu1  ;;  %v264_v50 = vsel %vm263_vm10, %v259_v48, 0.0 }
 0x1d3   :  { %265 = vadd.xlane.f32.xlu0 %v264_v50 }
 0x260   :  { %v266_v54 = vpop.xlane.xlu0 %265 }
 0x261   :  { %v271_v56 = vadd.f32 %v270_v53, %v266_v54 }
 0x263   :  { %v274_v57 = vadd.f32 %v273_v55, %v271_v56 }
 0x265   :  { %276 = vst.msk [vmem:[%s461_s4] sm:$0x3] %vm275_vm11, %v274_v57 }
 0x266   :  { %281 = vsyncpa [#allocation3], 1 }

</bundles_post_ra>
